<compile_context>
chip_gen: v5e
topology: v5e:2x2
jax: 0.10.0
libtpu: 0.0.40
codegen_flags: <defaults>
</compile_context>

<pallas_src>
import functools

import jax
import jax.numpy as jnp
from jax.experimental import pallas as pl
from jax.experimental.pallas import tpu as pltpu

LANE = 128
# ~6 MiB per block: input + output each double-buffered -> ~24 MiB pipelined
# working set, under the explicit 48 MiB scoped-VMEM limit and well under
# physical VMEM on every generation (v7x 64 MiB/TC, v5e/v6e 128 MiB).
_DEFAULT_BLOCK_BYTES = 6 * 1024 * 1024
_DEFAULT_VMEM_LIMIT_BYTES = 48 << 20
# Above this total size, force >= 2 grid steps so megacore (v7x) gets work on
# both TensorCores.
_MIN_MULTISTEP_BYTES = 1 << 20


def _block_bytes_and_vmem_limit():
    """Pick block bytes + scoped-VMEM limit, clamped to physical VMEM."""
    block = _DEFAULT_BLOCK_BYTES
    vmem_limit = _DEFAULT_VMEM_LIMIT_BYTES
    try:
        cap = int(pltpu.get_tpu_info().vmem_capacity_bytes)
        # Keep the scoped limit <= 3/4 of physical VMEM and the ~4x-block
        # pipelined working set comfortably inside it.
        vmem_limit = min(vmem_limit, (cap * 3) // 4)
        block = min(block, max(1 << 20, vmem_limit // 8))
    except Exception:
        pass  # conservative defaults are safe on all known generations
    return block, vmem_limit


def _exposure_kernel(x_ref, o_ref, *, scale, compute_dtype):
    # Purely elementwise: y = clamp(x * scale, 0, 1). `scale` is a Python
    # float folded into the vmul at trace time (no SMEM scalar).
    x = x_ref[...].astype(compute_dtype)
    o_ref[...] = jnp.clip(x * scale, 0.0, 1.0).astype(o_ref.dtype)


def _pick_lane_width(total):
    """Largest lane-dense width (multiple of 128) that evenly divides total."""
    for cand in (4096, 2048, 1024, 512, 256, 128):
        if total % cand == 0:
            return cand
    return None


def _pick_tile_rows(rows, max_rows, align, min_steps):
    """Choose a row-tile height.

    - Never exceeds the VMEM row budget `max_rows`.
    - Guarantees at least `min_steps` grid steps (megacore load balancing).
    - Accepts an exact divisor of `rows` only if it is >= ~half the cap;
      otherwise falls back to a near-max aligned tile with a masked partial
      tail block (avoids degrading to tiny 8-row tiles for awkward `rows`).
    """
    cap = max_rows if min_steps <= 1 else min(max_rows, pl.cdiv(rows, min_steps))
    cap = max(cap, align)
    if rows <= cap:
        return rows  # single full-height block (full-dim block needs no alignment)
    d = (cap // align) * align
    lo = max(align, cap // 2)
    while d >= lo:
        if rows % d == 0:
            return d
        d -= align
    # No "large enough" even divisor: ceil-div grid; the partial tail block is
    # masked by Pallas.
    return max(align, (cap // align) * align)


def exposure_compensation_forward(x, baseline_exposure=0.0, baseline_exposure_offset=0.0):
    """Pallas equivalent of ExposureCompensation(BE, BEO).forward(x).

    x: (B, C, H, W) float array (NCHW, matching the PyTorch module). Returns
    an array of the same shape/dtype. (Assumes float input, as in PyTorch.)
    """
    exposure = float(baseline_exposure) + float(baseline_exposure_offset)
    scale = float(2.0 ** exposure)

    orig_shape = x.shape
    orig_dtype = x.dtype
    total = int(x.size)
    if total == 0:
        return x
    itemsize = jnp.dtype(orig_dtype).itemsize
    sub_align = 8 * max(1, 4 // itemsize)  # 8 for f32, 16 for bf16, 32 for int8

    # Native bf16/f32 compute keeps vreg footprint minimal on v6e/v7x (bf16
    # VALU); any other dtype goes through f32.
    if orig_dtype in (jnp.dtype(jnp.float32), jnp.dtype(jnp.bfloat16)):
        compute_dtype = orig_dtype
    else:
        compute_dtype = jnp.float32

    W = _pick_lane_width(total)
    if W is not None:
        # Lane-dense slab view of x; pure reshape, no extra HBM passes.
        slab = x.reshape(total // W, W)
    else:
        # Ragged element count (not a multiple of 128): keep the natural
        # (rows, last-dim) view — still zero-copy, no pad/concatenate/slice
        # HBM passes. Last block dim equals the full array dim so any width is
        # legal; lanes are only partially used when last-dim < 128 (rare for
        # NCHW image tensors).
        # TODO(synk): pack the ragged tail into a lane-dense masked tile instead.
        last = orig_shape[-1] if len(orig_shape) >= 2 else total
        slab = x.reshape(total // last, last)
        W = int(slab.shape[1])

    rows = int(slab.shape[0])
    block_bytes, vmem_limit = _block_bytes_and_vmem_limit()
    max_rows = max(sub_align, block_bytes // max(1, W * itemsize))
    min_steps = 2 if total * itemsize > _MIN_MULTISTEP_BYTES else 1
    tile_rows = _pick_tile_rows(rows, max_rows, sub_align, min_steps)
    grid = (pl.cdiv(rows, tile_rows),)

    out = pl.pallas_call(
        functools.partial(_exposure_kernel, scale=scale, compute_dtype=compute_dtype),
        out_shape=jax.ShapeDtypeStruct(slab.shape, orig_dtype),
        grid=grid,
        in_specs=[pl.BlockSpec((tile_rows, W), lambda i: (i, 0))],
        out_specs=pl.BlockSpec((tile_rows, W), lambda i: (i, 0)),
        compiler_params=pltpu.CompilerParams(
            dimension_semantics=("parallel",),
            vmem_limit_bytes=vmem_limit),
    )(slab)

    return out.reshape(orig_shape)


if __name__ == "__main__":
    key = jax.random.PRNGKey(0)
    BaselineExposure = 0.5
    BaselineExposureOffset = 0.25
    scale = 2.0 ** (BaselineExposure + BaselineExposureOffset)

    # Small NCHW input consistent with an ISP image tensor.
    x = jax.random.uniform(key, (2, 4, 16, 16), dtype=jnp.float32,
                           minval=0.0, maxval=1.5)
    y = jax.block_until_ready(
        exposure_compensation_forward(x, BaselineExposure, BaselineExposureOffset))
    ref = jnp.clip(x * scale, 0.0, 1.0)
    assert y.shape == x.shape and y.dtype == x.dtype
    assert jnp.allclose(y, ref, atol=1e-6), "mismatch vs reference (small)"

    # Larger input to exercise the multi-block / megacore (grid >= 2) path.
    x2 = jax.random.uniform(jax.random.PRNGKey(1), (4, 3, 256, 256),
                            dtype=jnp.float32, minval=0.0, maxval=1.5)
    y2 = jax.block_until_ready(
        exposure_compensation_forward(x2, BaselineExposure, BaselineExposureOffset))
    ref2 = jnp.clip(x2 * scale, 0.0, 1.0)
    assert y2.shape == x2.shape and y2.dtype == x2.dtype
    assert jnp.allclose(y2, ref2, atol=1e-6), "mismatch vs reference (large)"

    # Ragged element count (not a multiple of 128): zero-copy view path.
    x3 = jax.random.uniform(jax.random.PRNGKey(2), (2, 3, 7, 9),
                            dtype=jnp.float32, minval=0.0, maxval=1.5)
    y3 = jax.block_until_ready(
        exposure_compensation_forward(x3, BaselineExposure, BaselineExposureOffset))
    ref3 = jnp.clip(x3 * scale, 0.0, 1.0)
    assert y3.shape == x3.shape and y3.dtype == x3.dtype
    assert jnp.allclose(y3, ref3, atol=1e-6), "mismatch vs reference (ragged)"

    # bf16 input: native bf16 compute inside the kernel.
    x4 = jax.random.uniform(jax.random.PRNGKey(3), (2, 4, 32, 32),
                            dtype=jnp.float32, minval=0.0, maxval=1.5).astype(jnp.bfloat16)
    y4 = jax.block_until_ready(
        exposure_compensation_forward(x4, BaselineExposure, BaselineExposureOffset))
    ref4 = jnp.clip(x4 * scale, 0.0, 1.0)
    assert y4.shape == x4.shape and y4.dtype == x4.dtype
    assert jnp.allclose(y4.astype(jnp.float32), ref4.astype(jnp.float32), atol=1e-2), \
        "mismatch vs reference (bf16)"

    print("KERNEL_OK")
</pallas_src>

<mosaic_0001>
module attributes {stable_mosaic.version = 11 : i64} {
  func.func @_exposure_kernel(%arg0: i32, %arg1: memref<1x2048xf32, #tpu.memory_space<vmem>>, %arg2: memref<1x2048xf32, #tpu.memory_space<vmem>>) attributes {dimension_semantics = [#tpu.dimension_semantics<parallel>], iteration_bounds = array<i64: 1>, scalar_prefetch = 0 : i64, scratch_operands = 0 : i64, tpu.core_type = #tpu.core_type<tc>, window_params = [{transform_indices = @transform_0, window_bounds = array<i64: 1, 2048>}, {transform_indices = @transform_1, window_bounds = array<i64: 1, 2048>}]} {
    %c0 = arith.constant 0 : index
    %c0_0 = arith.constant 0 : index
    %0 = vector.load %arg1[%c0, %c0_0] : memref<1x2048xf32, #tpu.memory_space<vmem>>, vector<1x2048xf32>
    %cst = arith.constant 1.68179286 : f32
    %1 = vector.broadcast %cst : f32 to vector<1x2048xf32>
    %2 = arith.mulf %0, %1 : vector<1x2048xf32>
    %cst_1 = arith.constant 0.000000e+00 : f32
    %cst_2 = arith.constant 1.000000e+00 : f32
    %3 = vector.broadcast %cst_1 : f32 to vector<1x2048xf32>
    %4 = arith.maximumf %3, %2 : vector<1x2048xf32>
    %5 = vector.broadcast %cst_2 : f32 to vector<1x2048xf32>
    %6 = arith.minimumf %5, %4 : vector<1x2048xf32>
    %c0_3 = arith.constant 0 : index
    %c0_4 = arith.constant 0 : index
    %7 = vector.load %arg2[%c0_3, %c0_4] : memref<1x2048xf32, #tpu.memory_space<vmem>>, vector<1x2048xf32>
    tpu.vector_store %arg2[%c0_3, %c0_4], %6 {strides = array<i32>} : memref<1x2048xf32, #tpu.memory_space<vmem>>, vector<1x2048xf32>,
    return
  }
  func.func @transform_0(%arg0: i32) -> (i32, i32) {
    %c0_i32 = arith.constant 0 : i32
    %c0_i32_0 = arith.constant 0 : i32
    return %arg0, %c0_i32 : i32, i32
  }
  func.func @transform_1(%arg0: i32) -> (i32, i32) {
    %c0_i32 = arith.constant 0 : i32
    %c0_i32_0 = arith.constant 0 : i32
    return %arg0, %c0_i32 : i32, i32
  }
}

</mosaic_0001>

<bundles_post_ra>
// kernel: tpu_custom_call.1
= control target key start
LH: loop header
LB: loop body
LE: loop exit
PB: predicated region body
PF: predicated region fallthrough
CT: control target
= control target key end

     0   :  { %6 = vsyncpa [#allocation3], 0  ;;  %s122_s0 = inlined_call_operand.hbm [shape: f32[1,2048], index: 0, kind: input, shape index: {}]   ;;  %s123_s1 = inlined_call_operand.hbm [shape: f32[1,2048], index: 1, kind: output, shape index: {}]  }
   0x1   :  { %7 = vsyncpa [#allocation4], 0  ;;  %s13_s8 = sshll.u32 %s122_s0, 4  ;;  %s104_s9 = smov [#allocation2]   ;;  %s14_s8 = int_to_ptr.hbm [resolvable:$true] %s13_s8 }
   0x2   :  { %s15_s10 = sshll.u32 %s104_s9, 4  ;;  %s16_s10 = int_to_ptr.vmem [resolvable:$true] %s15_s10 }
   0x3   :  { %18 = dma.hbm_to_vmem [thread:$0]  %s14_s8, 256, %s16_s10, [#allocation3]  }
   0x4   :  { %100 = dma.done.wait [#allocation3], 256  }
   0x5   :  { %101 = vsyncadd [#allocation3], 4294967040  ;;  %v23_v0 = vld [vmem:[#allocation2] sm:$0xff]  ;;  %v24_v1 = vld [vmem:[#allocation2 + $0x8] sm:$0xff]  ;;  %s105_s11 = smov [#allocation5]   ;;  %s40_s15 = sshll.u32 %s123_s1, 4  ;;  %s41_s15 = int_to_ptr.hbm [resolvable:$true] %s40_s15 }
   0x6   :  { %v25_v2 = vmul.f32 1.6817929, %v23_v0  ;;  %v26_v3 = vmul.f32 1.6817929, %v24_v1  ;;  %s38_s12 = sshll.u32 %s105_s11, 4  ;;  %s39_s12 = int_to_ptr.vmem [resolvable:$true] %s38_s12 }
   0x8   :  { %v27_v4 = vmax.f32 %v25_v2, 0.0  ;;  %v28_v5 = vmax.f32 %v26_v3, 0.0 }
   0xa   :  { %v29_v6 = vmin.f32 %v27_v4, 1.0  ;;  %v30_v7 = vmin.f32 %v28_v5, 1.0 }
   0xc   :  { %31 = vst [vmem:[#allocation5] sm:$0xff] %v29_v6 }
   0xd   :  { %32 = vst [vmem:[#allocation5 + $0x8] sm:$0xff] %v30_v7 }
   0xe   :  { %43 = dma.vmem_to_hbm [thread:$0]  %s39_s12, 256, %s41_s15, [#allocation4]  }
   0xf   :  { %102 = dma.done.wait [#allocation4], 256  }
  0x10   :  { %103 = vsyncadd [#allocation4], 4294967040 }
  0x11   :  { %48 = vsyncpa [#allocation3], 1 }
  0x12   :  { %49 = vsyncpa [#allocation4], 1 }

</bundles_post_ra>
